<compile_context>
chip_gen: v7x
topology: tpu7x:2x2x1
jax: 0.10.0
libtpu: 0.0.40
codegen_flags: <defaults>
</compile_context>

<pallas_src>
import functools

import jax
import jax.numpy as jnp
from jax import lax
from jax.experimental import pallas as pl
from jax.experimental.pallas import tpu as pltpu


def _skip_rms_norm_kernel(x_ref, skip_ref, w_ref, out_ref, skip_out_ref, *,
                          eps, inv_dim, reuse_skip_out):
    # All math in f32 for numerical parity with the reference op.
    x = x_ref[...].astype(jnp.float32)
    s = skip_ref[...].astype(jnp.float32)
    h = x + s                                         # skip-add
    # Store the residual stream immediately (overlaps with the reduction).
    skip_out_ref[...] = h.astype(skip_out_ref.dtype)
    if reuse_skip_out:
        # f32 path: re-read h from the output buffer, freeing the temporary.
        h = skip_out_ref[...]
    # Sum over the (possibly zero-padded) lane axis, divide by the true dim.
    ms = jnp.sum(h * h, axis=-1, keepdims=True) * inv_dim
    inv = lax.rsqrt(ms + eps)
    w = w_ref[...]                                    # (1, dim) f32, broadcast
    out_ref[...] = (h * inv * w).astype(out_ref.dtype)


def _sublane_multiple(dtype):
    nbytes = jnp.dtype(dtype).itemsize
    if nbytes >= 4:
        return 8
    if nbytes == 2:
        return 16
    return 32


def _round_up(a, b):
    return (a + b - 1) // b * b


def _vmem_capacity_bytes():
    try:
        info = pltpu.get_tpu_info()
        cap = getattr(info, "vmem_capacity_bytes", None)
        if cap:
            return int(cap)
    except Exception:
        pass
    # Conservative fallback (v7x per-TC size): smaller tiles, never OOM.
    return 64 << 20


def skip_rms_norm(x, weight, skip, eps=1e-6, *, tile_rows=None):
    """x, skip: (..., dim); weight: (dim,). Returns (out, skip_out)."""
    assert x.shape == skip.shape, "x and skip must have identical shapes"
    orig_shape = x.shape
    dim = orig_shape[-1]
    rows = 1
    for d in orig_shape[:-1]:
        rows *= d

    x2 = x.reshape(rows, dim)
    s2 = skip.reshape(rows, dim)
    w2 = weight.astype(jnp.float32).reshape(1, dim)

    # Lane-density guard: pad dim up to a multiple of 128 so both output
    # streams use unmasked full-lane stores.  Zero-padding both inputs keeps
    # sum(h^2) exact; the mean divides by the true dim inside the kernel.
    dim_p = _round_up(dim, 128)
    if dim_p != dim:
        pad = dim_p - dim
        x2 = jnp.pad(x2, ((0, 0), (0, pad)))
        s2 = jnp.pad(s2, ((0, 0), (0, pad)))
        w2 = jnp.pad(w2, ((0, 0), (0, pad)))

    dtype_bytes = jnp.dtype(x.dtype).itemsize
    sub = _sublane_multiple(x.dtype)
    reuse_skip_out = (jnp.dtype(x.dtype) == jnp.dtype(jnp.float32))

    vmem_cap = _vmem_capacity_bytes()
    small_vmem = vmem_cap <= (64 << 20)               # v7x: 64 MiB per TC

    if tile_rows is None:
        # I/O: 4 streams (x, skip, out, skip_out) double-buffered, plus f32
        # temporaries per row (upcasts / h / h^2 / pre-cast output).
        budget_bytes = min(vmem_cap // 3, 40 * 1024 * 1024)
        tmp_per_row = (12 if reuse_skip_out else 16) * dim_p
        per_row_bytes = 8 * dim_p * dtype_bytes + tmp_per_row
        tile_rows = max(sub, (budget_bytes // per_row_bytes) // sub * sub)
    # Never use a block taller than needed to cover all rows; keep sublane-aligned.
    tile_rows = max(sub, min(tile_rows, _round_up(rows, sub)))

    grid = (pl.cdiv(rows, tile_rows),)

    io_bytes = 4 * 2 * tile_rows * dim_p * dtype_bytes    # 4 streams, double-buffered
    tmp_bytes = (3 if reuse_skip_out else 4) * tile_rows * dim_p * 4
    w_bytes = 2 * dim_p * 4
    vmem_limit = io_bytes + tmp_bytes + w_bytes + (4 << 20)
    vmem_cap_limit = (40 << 20) if small_vmem else (48 << 20)
    vmem_limit = int(min(max(vmem_limit, 32 << 20), vmem_cap_limit))

    kernel = functools.partial(
        _skip_rms_norm_kernel,
        eps=float(eps),
        inv_dim=1.0 / float(dim),
        reuse_skip_out=reuse_skip_out,
    )

    out2, skip_out2 = pl.pallas_call(
        kernel,
        out_shape=(
            jax.ShapeDtypeStruct((rows, dim_p), x.dtype),
            jax.ShapeDtypeStruct((rows, dim_p), x.dtype),
        ),
        grid_spec=pltpu.PrefetchScalarGridSpec(
            num_scalar_prefetch=0,
            grid=grid,
            in_specs=[
                pl.BlockSpec((tile_rows, dim_p), lambda i: (i, 0)),
                pl.BlockSpec((tile_rows, dim_p), lambda i: (i, 0)),
                pl.BlockSpec((1, dim_p), lambda i: (0, 0)),
            ],
            out_specs=[
                pl.BlockSpec((tile_rows, dim_p), lambda i: (i, 0)),
                pl.BlockSpec((tile_rows, dim_p), lambda i: (i, 0)),
            ],
        ),
        compiler_params=pltpu.CompilerParams(
            dimension_semantics=("parallel",),
            vmem_limit_bytes=vmem_limit,
        ),
    )(x2, s2, w2)

    if dim_p != dim:
        out2 = out2[:, :dim]
        skip_out2 = skip_out2[:, :dim]

    return out2.reshape(orig_shape), skip_out2.reshape(orig_shape)


def _reference(x, weight, skip, eps=1e-6):
    h = x.astype(jnp.float32) + skip.astype(jnp.float32)
    ms = jnp.mean(h * h, axis=-1, keepdims=True)
    out = h * lax.rsqrt(ms + eps) * weight.astype(jnp.float32)
    return out.astype(x.dtype), h.astype(x.dtype)


def _check(x, weight, skip, eps=1e-6, atol=1e-5, rtol=1e-5, **kw):
    out, skip_out = skip_rms_norm(x, weight, skip, eps=eps, **kw)
    out, skip_out = jax.block_until_ready((out, skip_out))
    ref_out, ref_skip = _reference(x, weight, skip, eps=eps)
    assert jnp.allclose(out, ref_out, atol=atol, rtol=rtol), "out mismatch"
    assert jnp.allclose(skip_out, ref_skip, atol=atol, rtol=rtol), "skip_out mismatch"


if __name__ == "__main__":
    key = jax.random.PRNGKey(0)
    k1, k2, k3, k4, k5, k6 = jax.random.split(key, 6)

    # 1) Baseline small case: lane-dense dim, single block.
    batch, seq, dim = 2, 8, 128
    x = jax.random.normal(k1, (batch, seq, dim), dtype=jnp.float32)
    skip = jax.random.normal(k2, (batch, seq, dim), dtype=jnp.float32)
    weight = jnp.ones((dim,), dtype=jnp.float32)     # nn.Parameter(torch.ones(dim))
    _check(x, weight, skip)

    # 2) Ragged last row-block: rows=20, tile_rows=8 -> 3 grid steps (last masked).
    x_r = jax.random.normal(k3, (5, 4, dim), dtype=jnp.float32)
    s_r = jax.random.normal(k4, (5, 4, dim), dtype=jnp.float32)
    w_r = jax.random.normal(k5, (dim,), dtype=jnp.float32) * 0.1 + 1.0
    _check(x_r, w_r, s_r, tile_rows=8)

    # 3) Non-128-multiple dim exercises the lane-padding path.
    dim96 = 96
    x_p = jax.random.normal(k6, (2, 8, dim96), dtype=jnp.float32)
    s_p = jax.random.normal(k1, (2, 8, dim96), dtype=jnp.float32)
    w_p = jnp.ones((dim96,), dtype=jnp.float32)
    _check(x_p, w_p, s_p)

    # 4) bf16 inputs (looser tolerance; compare in f32).
    x_b = jax.random.normal(k2, (2, 8, dim), dtype=jnp.float32).astype(jnp.bfloat16)
    s_b = jax.random.normal(k3, (2, 8, dim), dtype=jnp.float32).astype(jnp.bfloat16)
    w_b = jnp.ones((dim,), dtype=jnp.float32)
    out_b, so_b = skip_rms_norm(x_b, w_b, s_b)
    out_b, so_b = jax.block_until_ready((out_b, so_b))
    ref_ob, ref_sb = _reference(x_b, w_b, s_b)
    assert jnp.allclose(out_b.astype(jnp.float32), ref_ob.astype(jnp.float32),
                        atol=2e-2, rtol=2e-2)
    assert jnp.allclose(so_b.astype(jnp.float32), ref_sb.astype(jnp.float32),
                        atol=2e-2, rtol=2e-2)

    print("KERNEL_OK")
</pallas_src>

<mosaic_0001>
module attributes {stable_mosaic.version = 11 : i64} {
  func.func @_skip_rms_norm_kernel(%arg0: i32, %arg1: memref<16x128xf32, #tpu.memory_space<vmem>>, %arg2: memref<16x128xf32, #tpu.memory_space<vmem>>, %arg3: memref<1x128xf32, #tpu.memory_space<vmem>>, %arg4: memref<16x128xf32, #tpu.memory_space<vmem>>, %arg5: memref<16x128xf32, #tpu.memory_space<vmem>>) attributes {dimension_semantics = [#tpu.dimension_semantics<parallel>], iteration_bounds = array<i64: 1>, scalar_prefetch = 0 : i64, scratch_operands = 0 : i64, tpu.core_type = #tpu.core_type<tc>, window_params = [{transform_indices = @transform_0, window_bounds = array<i64: 16, 128>}, {transform_indices = @transform_1, window_bounds = array<i64: 16, 128>}, {pipeline_mode = #tpu.pipeline_mode<synchronous>, transform_indices = @transform_2, window_bounds = array<i64: 1, 128>}, {transform_indices = @transform_3, window_bounds = array<i64: 16, 128>}, {transform_indices = @transform_4, window_bounds = array<i64: 16, 128>}]} {
    %c0 = arith.constant 0 : index
    %c0_0 = arith.constant 0 : index
    %0 = vector.load %arg1[%c0, %c0_0] : memref<16x128xf32, #tpu.memory_space<vmem>>, vector<16x128xf32>
    %c0_1 = arith.constant 0 : index
    %c0_2 = arith.constant 0 : index
    %1 = vector.load %arg2[%c0_1, %c0_2] : memref<16x128xf32, #tpu.memory_space<vmem>>, vector<16x128xf32>
    %2 = arith.addf %0, %1 : vector<16x128xf32>
    %c0_3 = arith.constant 0 : index
    %c0_4 = arith.constant 0 : index
    %3 = vector.load %arg5[%c0_3, %c0_4] : memref<16x128xf32, #tpu.memory_space<vmem>>, vector<16x128xf32>
    tpu.vector_store %arg5[%c0_3, %c0_4], %2 {strides = array<i32>} : memref<16x128xf32, #tpu.memory_space<vmem>>, vector<16x128xf32>,
    %c0_5 = arith.constant 0 : index
    %c0_6 = arith.constant 0 : index
    %4 = vector.load %arg5[%c0_5, %c0_6] : memref<16x128xf32, #tpu.memory_space<vmem>>, vector<16x128xf32>
    %5 = arith.mulf %4, %4 : vector<16x128xf32>
    %cst = arith.constant dense<0.000000e+00> : vector<16xf32>
    %6 = vector.multi_reduction <add>, %5, %cst [1] : vector<16x128xf32> to vector<16xf32>
    %7 = vector.shape_cast %6 : vector<16xf32> to vector<16x1xf32>
    %cst_7 = arith.constant 7.812500e-03 : f32
    %8 = vector.broadcast %cst_7 : f32 to vector<16x1xf32>
    %9 = arith.mulf %7, %8 : vector<16x1xf32>
    %cst_8 = arith.constant 9.99999997E-7 : f32
    %10 = vector.broadcast %cst_8 : f32 to vector<16x1xf32>
    %11 = arith.addf %9, %10 : vector<16x1xf32>
    %12 = math.rsqrt %11 : vector<16x1xf32>
    %c0_9 = arith.constant 0 : index
    %c0_10 = arith.constant 0 : index
    %13 = vector.load %arg3[%c0_9, %c0_10] : memref<1x128xf32, #tpu.memory_space<vmem>>, vector<1x128xf32>
    %14 = vector.broadcast %12 : vector<16x1xf32> to vector<16x128xf32>
    %15 = arith.mulf %4, %14 : vector<16x128xf32>
    %16 = vector.broadcast %13 : vector<1x128xf32> to vector<16x128xf32>
    %17 = arith.mulf %15, %16 : vector<16x128xf32>
    %c0_11 = arith.constant 0 : index
    %c0_12 = arith.constant 0 : index
    %18 = vector.load %arg4[%c0_11, %c0_12] : memref<16x128xf32, #tpu.memory_space<vmem>>, vector<16x128xf32>
    tpu.vector_store %arg4[%c0_11, %c0_12], %17 {strides = array<i32>} : memref<16x128xf32, #tpu.memory_space<vmem>>, vector<16x128xf32>,
    return
  }
  func.func @transform_0(%arg0: i32) -> (i32, i32) {
    %c0_i32 = arith.constant 0 : i32
    %c0_i32_0 = arith.constant 0 : i32
    return %arg0, %c0_i32 : i32, i32
  }
  func.func @transform_1(%arg0: i32) -> (i32, i32) {
    %c0_i32 = arith.constant 0 : i32
    %c0_i32_0 = arith.constant 0 : i32
    return %arg0, %c0_i32 : i32, i32
  }
  func.func @transform_2(%arg0: i32) -> (i32, i32) {
    %c0_i32 = arith.constant 0 : i32
    %c0_i32_0 = arith.constant 0 : i32
    %c0_i32_1 = arith.constant 0 : i32
    return %c0_i32, %c0_i32_0 : i32, i32
  }
  func.func @transform_3(%arg0: i32) -> (i32, i32) {
    %c0_i32 = arith.constant 0 : i32
    %c0_i32_0 = arith.constant 0 : i32
    return %arg0, %c0_i32 : i32, i32
  }
  func.func @transform_4(%arg0: i32) -> (i32, i32) {
    %c0_i32 = arith.constant 0 : i32
    %c0_i32_0 = arith.constant 0 : i32
    return %arg0, %c0_i32 : i32, i32
  }
}

</mosaic_0001>

<bundles_post_ra>
// kernel: tpu_custom_call.1
= control target key start
LH: loop header
LB: loop body
LE: loop exit
PB: predicated region body
PF: predicated region fallthrough
CT: control target
= control target key end

     0   :  { %10 = vsyncpa [#allocation3], 0  ;;  %s316_s0 = inlined_call_operand.hbm [shape: f32[16,128], index: 0, kind: input, shape index: {}]   ;;  %s317_s1 = inlined_call_operand.hbm [shape: f32[16,128], index: 1, kind: input, shape index: {}]   ;;  %s318_s2 = inlined_call_operand.vmem [shape: f32[1,128], index: 2, kind: input, shape index: {}]   ;;  %s319_s3 = inlined_call_operand.hbm [shape: f32[16,128], index: 3, kind: output, shape index: {0}]   ;;  %s320_s4 = inlined_call_operand.hbm [shape: f32[16,128], index: 4, kind: output, shape index: {1}]  }
   0x1   :  { %11 = vsyncpa [#allocation6], 0 }
   0x2   :  { %12 = vsyncpa [#allocation4], 0 }
   0x3   :  { %13 = vsyncpa [#allocation9], 0  ;;  %s222_s15 = smov [#allocation2]   ;;  %s126_s19 = scalar_lea.hbm %s316_s0, 256 }
   0x4   :  { %s19_s16 = sshll.u32 %s222_s15, 4  ;;  %p127_p0 = scmp.ne.s32.totalorder %s316_s0, %s126_s19  ;;  %s20_s16 = int_to_ptr.vmem [resolvable:$true] %s19_s16 }
   0x5   :  { %p130_p1 = scmp.lt.u32.totalorder %s126_s19, %s316_s0 }
   0x7   :  { %p132_p2 = pnand %p130_p1, %p127_p0 }
   0x9   :  { %135 = shalt.err (!%p132_p2)
}
   0xa   :  { %s136_s24 = scalar_lea.vmem %s20_s16, 256  ;;  %p141_p4 = scmp.lt.s32.totalorder %s20_s16, %s20_s16 }
   0xb   :  { %p137_p3 = scmp.ne.s32.totalorder %s20_s16, %s136_s24  ;;  %p142_p5 = scmp.lt.s32.totalorder %s136_s24, %s136_s24 }
   0xd   :  { %p143_p6 = por %p142_p5, %p141_p4 }
   0xf   :  { %p144_p7 = pnand %p143_p6, %p137_p3 }
  0x11   :  { %147 = shalt.err (!%p144_p7)
}
  0x12   :  { %s223_s25 = smov 128   ;;  %s224_s26 = smov 8  }
  0x13   :  { %25 = dma.hbm_to_vmem [thread:$0]  %s316_s0, 256, %s20_s16, [#allocation3], %s223_s25, %s223_s25, %s224_s26  }
  0x14   :  { %s225_s29 = smov [#allocation5]   ;;  %s148_s7 = scalar_lea.hbm %s317_s1, 256 }
  0x15   :  { %s31_s30 = sshll.u32 %s225_s29, 4  ;;  %p149_p8 = scmp.ne.s32.totalorder %s317_s1, %s148_s7  ;;  %s32_s30 = int_to_ptr.vmem [resolvable:$true] %s31_s30 }
  0x16   :  { %p152_p9 = scmp.lt.u32.totalorder %s148_s7, %s317_s1 }
  0x18   :  { %p154_p10 = pnand %p152_p9, %p149_p8 }
  0x1a   :  { %157 = shalt.err (!%p154_p10)
}
  0x1b   :  { %s158_s12 = scalar_lea.vmem %s32_s30, 256  ;;  %p163_p12 = scmp.lt.s32.totalorder %s32_s30, %s32_s30 }
  0x1c   :  { %p159_p11 = scmp.ne.s32.totalorder %s32_s30, %s158_s12  ;;  %p164_p13 = scmp.lt.s32.totalorder %s158_s12, %s158_s12 }
  0x1e   :  { %p165_p0 = por %p164_p13, %p163_p12 }
  0x20   :  { %p166_p1 = pnand %p165_p0, %p159_p11 }
  0x22   :  { %169 = shalt.err (!%p166_p1)
}
  0x23   :  { %37 = dma.hbm_to_vmem [thread:$0]  %s317_s1, 256, %s32_s30, [#allocation6], %s223_s25, %s223_s25, %s224_s26  }
  0x24   :  { %214 = dma.done.wait [#allocation3], 256  }
  0x25   :  { %215 = vsyncadd [#allocation3], 4294967040 }
  0x26   :  { %216 = dma.done.wait [#allocation6], 256  }
  0x27   :  { %217 = vsyncadd [#allocation6], 4294967040  ;;  %v46_v0 = vld [vmem:[#allocation2] sm:$0xff]  ;;  %v48_v1 = vld [vmem:[#allocation5] sm:$0xff]  ;;  %s226_s14 = smov [#allocation8]  }
  0x28   :  { %v47_v2 = vld [vmem:[#allocation2 + $0x8] sm:$0xff]  ;;  %v50_v3 = vadd.f32 %v48_v1, %v46_v0  ;;  %v49_v4 = vld [vmem:[#allocation5 + $0x8] sm:$0xff]  ;;  %s98_s15 = sshll.u32 %s226_s14, 4  ;;  %s99_s15 = int_to_ptr.vmem [resolvable:$true] %s98_s15 }
  0x29   :  { %v51_v5 = vadd.f32 %v49_v4, %v47_v2  ;;  %s170_s1 = scalar_lea.vmem %s99_s15, 256  ;;  %p175_p3 = scmp.lt.s32.totalorder %s99_s15, %s99_s15 }
  0x2a   :  { %52 = vst [vmem:[#allocation8] sm:$0xff] %v50_v3  ;;  %v56_v6 = vmul.f32 %v50_v3, %v50_v3  ;;  %p171_p2 = scmp.ne.s32.totalorder %s99_s15, %s170_s1  ;;  %p176_p4 = scmp.lt.s32.totalorder %s170_s1, %s170_s1 }
  0x2b   :  { %53 = vst [vmem:[#allocation8 + $0x8] sm:$0xff] %v51_v5  ;;  %v57_v7 = vmul.f32 %v51_v5, %v51_v5 }
  0x2c   :  { %58 = vadd.xlane.f32.xlu0 %v56_v6  ;;  %p177_p5 = por %p176_p4, %p175_p3 }
  0x2e   :  { %p178_p6 = pnand %p177_p5, %p171_p2 }
  0x30   :  { %60 = vadd.xlane.f32.xlu0 %v57_v7 }
  0x31   :  { %181 = shalt.err (!%p178_p6)
}
  0x32   :  { %s182_s18 = scalar_lea.hbm %s320_s4, 256 }
  0x33   :  { %p183_p7 = scmp.ne.s32.totalorder %s320_s4, %s182_s18  ;;  %p186_p8 = scmp.lt.u32.totalorder %s182_s18, %s320_s4 }
  0x35   :  { %p188_p9 = pnand %p186_p8, %p183_p7 }
  0x37   :  { %191 = shalt.err (!%p188_p9)
}
  0x38   :  { %104 = dma.vmem_to_hbm [thread:$0]  %s99_s15, 256, %s320_s4, [#allocation9], %s223_s25, %s223_s25, %s224_s26  }
  0x39   :  { %v115_v15 = vld [vmem:[%s318_s2] ss:$0 sm:$0xff]  ;;  %s227_s29 = smov [#allocation7]  }
  0x3a   :  { %s86_s30 = sshll.u32 %s227_s29, 4  ;;  %s87_s30 = int_to_ptr.vmem [resolvable:$true] %s86_s30 }
  0x3b   :  { %s192_s4 = scalar_lea.vmem %s87_s30, 256  ;;  %p197_p11 = scmp.lt.s32.totalorder %s87_s30, %s87_s30 }
  0x3c   :  { %p193_p10 = scmp.ne.s32.totalorder %s87_s30, %s192_s4  ;;  %p198_p12 = scmp.lt.s32.totalorder %s192_s4, %s192_s4 }
  0x3e   :  { %p199_p13 = por %p198_p12, %p197_p11 }
  0x40   :  { %p200_p0 = pnand %p199_p13, %p193_p10 }
  0xb9   :  { %v59_v8 = vpop.xlane.xlu0 %58 }
  0xba   :  { %v62_v9 = vmul.f32 0.0078125, %v59_v8 }
  0xbc   :  { %v64_v10 = vadd.f32 1e-06, %v62_v9 }
  0xbd   :  { %v61_v11 = vpop.xlane.xlu0 %60 }
  0xbe   :  { %122 = vrsqrt.f32 %v64_v10  ;;  %v63_v12 = vmul.f32 0.0078125, %v61_v11 }
  0xc0   :  { %v65_v13 = vadd.f32 1e-06, %v63_v12 }
  0xc2   :  { %124 = vrsqrt.f32 %v65_v13 }
  0xc8   :  { %v123_v14 = vpop.eup %122 }
  0xc9   :  { %v69_v16 = vmul.f32 %v123_v14, %v50_v3 }
  0xcb   :  { %v77_v17 = vmul.f32 %v115_v15, %v69_v16 }
  0xcc   :  { %v125_v18 = vpop.eup %124 }
  0xcd   :  { %v70_v19 = vmul.f32 %v125_v18, %v51_v5  ;;  %79 = vst [vmem:[#allocation7] sm:$0xff] %v77_v17 }
  0xcf   :  { %v78_v20 = vmul.f32 %v115_v15, %v70_v19 }
  0xd1   :  { %80 = vst [vmem:[#allocation7 + $0x8] sm:$0xff] %v78_v20 }
  0xd2   :  { %203 = shalt.err (!%p200_p0)
}
  0xd3   :  { %s204_s2 = scalar_lea.hbm %s319_s3, 256 }
  0xd4   :  { %p205_p1 = scmp.ne.s32.totalorder %s319_s3, %s204_s2  ;;  %p208_p2 = scmp.lt.u32.totalorder %s204_s2, %s319_s3 }
  0xd6   :  { %p210_p3 = pnand %p208_p2, %p205_p1 }
  0xd8   :  { %213 = shalt.err (!%p210_p3)
}
  0xd9   :  { %92 = dma.vmem_to_hbm [thread:$0]  %s87_s30, 256, %s319_s3, [#allocation4], %s223_s25, %s223_s25, %s224_s26  }
  0xda   :  { %218 = dma.done.wait [#allocation4], 256  }
  0xdb   :  { %219 = vsyncadd [#allocation4], 4294967040 }
  0xdc   :  { %220 = dma.done.wait [#allocation9], 256  }
  0xdd   :  { %221 = vsyncadd [#allocation9], 4294967040 }
  0xde   :  { %111 = vsyncpa [#allocation3], 1 }
  0xdf   :  { %112 = vsyncpa [#allocation6], 1 }
  0xe0   :  { %113 = vsyncpa [#allocation4], 1 }
  0xe1   :  { %114 = vsyncpa [#allocation9], 1 }

</bundles_post_ra>
